<compile_context>
chip_gen: v6e
topology: v6e:2x2x1
jax: 0.10.0
libtpu: 0.0.40
codegen_flags: <defaults>
</compile_context>

<pallas_src>
from typing import NamedTuple

import jax
import jax.numpy as jnp
from jax.experimental import pallas as pl
from jax.experimental.pallas import tpu as pltpu

NEG_SLOPE = 0.01  # nn.LeakyReLU() default


def _leaky_relu(x):
    # Identical to LeakyReLU for 0 < slope < 1; one max instead of cmp+select.
    return jnp.maximum(x, NEG_SLOPE * x)


def _round_up(n, m):
    return ((n + m - 1) // m) * m


def _vmem_capacity_bytes():
    try:
        return int(pltpu.get_tpu_info().vmem_capacity_bytes)
    except Exception:
        return 64 * 1024 * 1024  # conservative fallback (v7x per-TC VMEM)


# ----------------------------------------------------------------------------
# Parameters: pad / cast ONCE at init, not per forward call.
# ----------------------------------------------------------------------------
class EbdParams(NamedTuple):
    w1: jax.Array          # (K, H_p)   compute dtype, H zero-padded to 128-mult
    b1: jax.Array          # (1, H_p)   f32
    w2: jax.Array          # (H_p, H_p) compute dtype
    b2: jax.Array          # (1, H_p)   f32
    hidden_size: int       # true H (for slicing the padded output)


def prepare_params(w1, b1, w2, b2, *, compute_dtype=jnp.bfloat16):
    """w1:(in,H), b1:(1,H) or (H,), w2:(H,H), b2 like b1. Pads H to a 128-multiple.

    Zero padding is mathematically exact: padded columns/rows and padded bias are
    zero, leaky_relu(0)==0, and padded output columns are sliced off.
    """
    K, H = w1.shape
    H_p = _round_up(H, 128)
    cdt = jnp.dtype(compute_dtype)
    w1_p = jnp.zeros((K, H_p), cdt).at[:, :H].set(w1.astype(cdt))
    w2_p = jnp.zeros((H_p, H_p), cdt).at[:H, :H].set(w2.astype(cdt))
    b1_p = jnp.zeros((1, H_p), jnp.float32).at[:, :H].set(
        jnp.reshape(b1, (1, H)).astype(jnp.float32))
    b2_p = jnp.zeros((1, H_p), jnp.float32).at[:, :H].set(
        jnp.reshape(b2, (1, H)).astype(jnp.float32))
    return EbdParams(w1_p, b1_p, w2_p, b2_p, H)


# ----------------------------------------------------------------------------
# Kernels
# ----------------------------------------------------------------------------
def _ebd_kernel_fused(x_ref, w1_ref, b1_ref, w2_ref, b2_ref, o_ref):
    # Weights fully resident (single-buffered); x / out tiles stream over batch.
    x = x_ref[...].astype(w1_ref.dtype)
    h = jnp.dot(x, w1_ref[...], preferred_element_type=jnp.float32)
    h = _leaky_relu(h + b1_ref[...])
    y = jnp.dot(h.astype(w2_ref.dtype), w2_ref[...],
                preferred_element_type=jnp.float32)
    o_ref[...] = _leaky_relu(y + b2_ref[...]).astype(o_ref.dtype)


def _ebd_kernel_htiled(x_ref, w1_ref, b1_ref, w2_ref, b2_ref, o_ref, h_ref):
    # Grid: (batch tiles, W2-column tiles). h is computed once per batch tile
    # (inner axis j == 0) into VMEM scratch and reused across W2 column tiles.
    @pl.when(pl.program_id(1) == 0)
    def _():
        x = x_ref[...].astype(w1_ref.dtype)
        h = jnp.dot(x, w1_ref[...], preferred_element_type=jnp.float32)
        h_ref[...] = _leaky_relu(h + b1_ref[...])

    y = jnp.dot(h_ref[...].astype(w2_ref.dtype), w2_ref[...],
                preferred_element_type=jnp.float32)
    o_ref[...] = _leaky_relu(y + b2_ref[...]).astype(o_ref.dtype)


# ----------------------------------------------------------------------------
# Wrapper
# ----------------------------------------------------------------------------
def ebd_layer(x, params: EbdParams, *, out_dtype=None, max_tile_b=2048):
    """x: (B, in_size) -> (B, hidden_size). params from prepare_params()."""
    B, K = x.shape
    H = params.hidden_size
    H_p = params.w1.shape[1]
    assert params.w1.shape[0] == K, "in_size mismatch between x and params"

    out_dtype = jnp.dtype(x.dtype if out_dtype is None else out_dtype)
    cb = jnp.dtype(params.w1.dtype).itemsize
    xb = jnp.dtype(x.dtype).itemsize
    ob = out_dtype.itemsize

    # Generation-aware VMEM budget with headroom (~50 MiB v7x, ~100 MiB v5e/v6e).
    usable = int(_vmem_capacity_bytes() * 0.78)

    # Footprint models (bytes). Weights single-buffered (Buffered(1)); x/out
    # double-buffered; f32 h / y intermediates counted per row.
    per_row_simple = 2 * (K * xb + H_p * ob) + 2 * H_p * 4
    resident_fixed = (K * H_p + H_p * H_p) * cb + 2 * H_p * 4
    tile_hidden = resident_fixed + 8 * per_row_simple > usable

    if not tile_hidden:
        fixed = resident_fixed
        per_row = per_row_simple
        tile_b = (usable - fixed) // max(per_row, 1)
    else:
        # Stream W2 in column tiles of width tile_h; keep W1 resident.
        tile_h = min(512, H_p)

        def _fixed_h(th):
            return (K * H_p) * cb + H_p * 4 + 2 * (H_p * th * cb + th * 4)

        def _per_row_h(th):
            return 2 * (K * xb + th * ob) + H_p * 4 + th * 4

        while tile_h > 128 and _fixed_h(tile_h) + 8 * _per_row_h(tile_h) > usable:
            tile_h = max(128, ((tile_h // 2) // 128) * 128)
        fixed = _fixed_h(tile_h)
        per_row = _per_row_h(tile_h)
        tile_b = max(8, (usable - fixed) // max(per_row, 1)) if usable > fixed else 8
        # TODO(synk): if W1 alone (K * H_p) exceeds the VMEM budget, an additional
        # contraction(K)-tiling pass would be required; not implemented.

    # Batch tile: clamp, never exceed ~B, align sublanes (16 rows for 16-bit streams).
    b_cap = _round_up(B, 8)
    tile_b = int(min(tile_b, max_tile_b, b_cap))
    align = 16 if (cb == 2 or xb == 2) else 8
    if tile_b >= align:
        tile_b = (tile_b // align) * align
    tile_b = max(8, (tile_b // 8) * 8)

    need = fixed + tile_b * per_row
    vmem_limit = int(min(usable, max(32 * 1024 * 1024, need + need // 4 + (2 << 20))))

    cost = pl.CostEstimate(
        flops=2 * B * H_p * (K + H_p),
        transcendentals=0,
        bytes_accessed=int(B * K * xb + (K * H_p + H_p * H_p) * cb
                           + 2 * H_p * 4 + B * H_p * ob),
    )

    nb = pl.cdiv(B, tile_b)
    resident1 = pl.Buffered(1)  # constant-index blocks: no second pipeline buffer

    if not tile_hidden:
        out_p = pl.pallas_call(
            _ebd_kernel_fused,
            out_shape=jax.ShapeDtypeStruct((B, H_p), out_dtype),
            grid_spec=pltpu.PrefetchScalarGridSpec(
                num_scalar_prefetch=0,
                grid=(nb,),
                in_specs=[
                    pl.BlockSpec((tile_b, K), lambda i: (i, 0)),
                    pl.BlockSpec((K, H_p), lambda i: (0, 0), pipeline_mode=resident1),
                    pl.BlockSpec((1, H_p), lambda i: (0, 0), pipeline_mode=resident1),
                    pl.BlockSpec((H_p, H_p), lambda i: (0, 0), pipeline_mode=resident1),
                    pl.BlockSpec((1, H_p), lambda i: (0, 0), pipeline_mode=resident1),
                ],
                out_specs=pl.BlockSpec((tile_b, H_p), lambda i: (i, 0)),
            ),
            compiler_params=pltpu.CompilerParams(
                # TODO(synk): on v7x confirm in a trace that both TCs shard this
                # axis; switch to pltpu.CORE_PARALLEL if plain "parallel" doesn't.
                dimension_semantics=("parallel",),
                vmem_limit_bytes=vmem_limit,
            ),
            cost_estimate=cost,
        )(x, params.w1, params.b1, params.w2, params.b2)
    else:
        nh = pl.cdiv(H_p, tile_h)
        out_p = pl.pallas_call(
            _ebd_kernel_htiled,
            out_shape=jax.ShapeDtypeStruct((B, H_p), out_dtype),
            grid_spec=pltpu.PrefetchScalarGridSpec(
                num_scalar_prefetch=0,
                grid=(nb, nh),
                in_specs=[
                    pl.BlockSpec((tile_b, K), lambda i, j: (i, 0)),
                    pl.BlockSpec((K, H_p), lambda i, j: (0, 0), pipeline_mode=resident1),
                    pl.BlockSpec((1, H_p), lambda i, j: (0, 0), pipeline_mode=resident1),
                    pl.BlockSpec((H_p, tile_h), lambda i, j: (0, j)),   # streamed W2 tiles
                    pl.BlockSpec((1, tile_h), lambda i, j: (0, j)),
                ],
                out_specs=pl.BlockSpec((tile_b, tile_h), lambda i, j: (i, j)),
                scratch_shapes=[pltpu.VMEM((tile_b, H_p), jnp.float32)],
            ),
            compiler_params=pltpu.CompilerParams(
                dimension_semantics=("parallel", "arbitrary"),
                vmem_limit_bytes=vmem_limit,
            ),
            cost_estimate=cost,
        )(x, params.w1, params.b1, params.w2, params.b2)

    return out_p if H_p == H else out_p[:, :H]


# ----------------------------------------------------------------------------
# Reference + init (for the self-test)
# ----------------------------------------------------------------------------
def init_params(key, in_size, hidden_size):
    """PyTorch nn.Linear default init U(-1/sqrt(fan_in), +), stored transposed."""
    k1, k2, k3, k4 = jax.random.split(key, 4)
    bound1 = 1.0 / jnp.sqrt(in_size)
    bound2 = 1.0 / jnp.sqrt(hidden_size)
    w1 = jax.random.uniform(k1, (in_size, hidden_size), jnp.float32, -bound1, bound1)
    b1 = jax.random.uniform(k2, (1, hidden_size), jnp.float32, -bound1, bound1)
    w2 = jax.random.uniform(k3, (hidden_size, hidden_size), jnp.float32, -bound2, bound2)
    b2 = jax.random.uniform(k4, (1, hidden_size), jnp.float32, -bound2, bound2)
    return w1, b1, w2, b2


def ebd_layer_ref(x, w1, b1, w2, b2):
    h = _leaky_relu(x @ w1 + b1)
    y = _leaky_relu(h @ w2 + b2)
    return y


if __name__ == "__main__":
    key = jax.random.PRNGKey(0)
    in_size, hidden_size, batch = 16, 32, 8

    kx, kp = jax.random.split(key)
    x = jax.random.normal(kx, (batch, in_size), jnp.float32)
    w1, b1, w2, b2 = init_params(kp, in_size, hidden_size)

    ref = ebd_layer_ref(x, w1, b1, w2, b2)

    # Exact (f32 weight-stream) path: matches PyTorch semantics tightly.
    params_f32 = prepare_params(w1, b1, w2, b2, compute_dtype=jnp.float32)
    out = jax.block_until_ready(ebd_layer(x, params_f32))
    assert out.shape == (batch, hidden_size)
    assert jnp.allclose(out, ref, atol=1e-5, rtol=1e-5), "f32 mismatch vs reference"

    # Default bf16 weight-stream path (f32 accumulation); looser tolerance.
    params_bf16 = prepare_params(w1, b1, w2, b2)  # compute_dtype=bf16 default
    out_bf16 = jax.block_until_ready(ebd_layer(x, params_bf16))
    assert out_bf16.shape == (batch, hidden_size)
    assert jnp.allclose(out_bf16.astype(jnp.float32), ref, atol=5e-2, rtol=5e-2), \
        "bf16 mismatch vs reference"

    print("KERNEL_OK")
</pallas_src>

<mosaic_0001>
module attributes {stable_mosaic.version = 11 : i64} {
  func.func @_ebd_kernel_fused(%arg0: i32, %arg1: memref<8x16xf32, #tpu.memory_space<vmem>>, %arg2: memref<16x128xf32, #tpu.memory_space<vmem>>, %arg3: memref<1x128xf32, #tpu.memory_space<vmem>>, %arg4: memref<128x128xf32, #tpu.memory_space<vmem>>, %arg5: memref<1x128xf32, #tpu.memory_space<vmem>>, %arg6: memref<8x128xf32, #tpu.memory_space<vmem>>) attributes {dimension_semantics = [#tpu.dimension_semantics<parallel>], iteration_bounds = array<i64: 1>, scalar_prefetch = 0 : i64, scratch_operands = 0 : i64, tpu.core_type = #tpu.core_type<tc>, window_params = [{transform_indices = @transform_0, window_bounds = array<i64: 8, 16>}, {pipeline_mode = #tpu.pipeline_mode<synchronous>, transform_indices = @transform_1, window_bounds = array<i64: 16, 128>}, {pipeline_mode = #tpu.pipeline_mode<synchronous>, transform_indices = @transform_2, window_bounds = array<i64: 1, 128>}, {pipeline_mode = #tpu.pipeline_mode<synchronous>, transform_indices = @transform_3, window_bounds = array<i64: 128, 128>}, {pipeline_mode = #tpu.pipeline_mode<synchronous>, transform_indices = @transform_4, window_bounds = array<i64: 1, 128>}, {transform_indices = @transform_5, window_bounds = array<i64: 8, 128>}]} {
    %c0 = arith.constant 0 : index
    %c0_0 = arith.constant 0 : index
    %0 = vector.load %arg1[%c0, %c0_0] : memref<8x16xf32, #tpu.memory_space<vmem>>, vector<8x16xf32>
    %c0_1 = arith.constant 0 : index
    %c0_2 = arith.constant 0 : index
    %1 = vector.load %arg2[%c0_1, %c0_2] : memref<16x128xf32, #tpu.memory_space<vmem>>, vector<16x128xf32>
    %cst = arith.constant dense<0.000000e+00> : vector<8x128xf32>
    %2 = tpu.matmul %0, %1, %cst {dimension_numbers = #tpu.dot_dimension_numbers<[1], [0], [0], [1], [0, 0, 1, 1], [], []>} : vector<8x16xf32>, vector<16x128xf32>, vector<8x128xf32> -> vector<8x128xf32>
    %c0_3 = arith.constant 0 : index
    %c0_4 = arith.constant 0 : index
    %3 = vector.load %arg3[%c0_3, %c0_4] : memref<1x128xf32, #tpu.memory_space<vmem>>, vector<1x128xf32>
    %4 = vector.broadcast %3 : vector<1x128xf32> to vector<8x128xf32>
    %5 = arith.addf %2, %4 : vector<8x128xf32>
    %cst_5 = arith.constant 0.00999999977 : f32
    %6 = vector.broadcast %cst_5 : f32 to vector<8x128xf32>
    %7 = arith.mulf %6, %5 : vector<8x128xf32>
    %8 = arith.maximumf %5, %7 : vector<8x128xf32>
    %c0_6 = arith.constant 0 : index
    %c0_7 = arith.constant 0 : index
    %9 = vector.load %arg4[%c0_6, %c0_7] : memref<128x128xf32, #tpu.memory_space<vmem>>, vector<128x128xf32>
    %cst_8 = arith.constant dense<0.000000e+00> : vector<8x128xf32>
    %10 = tpu.matmul %8, %9, %cst_8 {dimension_numbers = #tpu.dot_dimension_numbers<[1], [0], [0], [1], [0, 0, 1, 1], [], []>} : vector<8x128xf32>, vector<128x128xf32>, vector<8x128xf32> -> vector<8x128xf32>
    %c0_9 = arith.constant 0 : index
    %c0_10 = arith.constant 0 : index
    %11 = vector.load %arg5[%c0_9, %c0_10] : memref<1x128xf32, #tpu.memory_space<vmem>>, vector<1x128xf32>
    %12 = vector.broadcast %11 : vector<1x128xf32> to vector<8x128xf32>
    %13 = arith.addf %10, %12 : vector<8x128xf32>
    %cst_11 = arith.constant 0.00999999977 : f32
    %14 = vector.broadcast %cst_11 : f32 to vector<8x128xf32>
    %15 = arith.mulf %14, %13 : vector<8x128xf32>
    %16 = arith.maximumf %13, %15 : vector<8x128xf32>
    %c0_12 = arith.constant 0 : index
    %c0_13 = arith.constant 0 : index
    %17 = vector.load %arg6[%c0_12, %c0_13] : memref<8x128xf32, #tpu.memory_space<vmem>>, vector<8x128xf32>
    tpu.vector_store %arg6[%c0_12, %c0_13], %16 {strides = array<i32>} : memref<8x128xf32, #tpu.memory_space<vmem>>, vector<8x128xf32>,
    return
  }
  func.func @transform_0(%arg0: i32) -> (i32, i32) {
    %c0_i32 = arith.constant 0 : i32
    %c0_i32_0 = arith.constant 0 : i32
    return %arg0, %c0_i32 : i32, i32
  }
  func.func @transform_1(%arg0: i32) -> (i32, i32) {
    %c0_i32 = arith.constant 0 : i32
    %c0_i32_0 = arith.constant 0 : i32
    %c0_i32_1 = arith.constant 0 : i32
    return %c0_i32, %c0_i32_0 : i32, i32
  }
  func.func @transform_2(%arg0: i32) -> (i32, i32) {
    %c0_i32 = arith.constant 0 : i32
    %c0_i32_0 = arith.constant 0 : i32
    %c0_i32_1 = arith.constant 0 : i32
    return %c0_i32, %c0_i32_0 : i32, i32
  }
  func.func @transform_3(%arg0: i32) -> (i32, i32) {
    %c0_i32 = arith.constant 0 : i32
    %c0_i32_0 = arith.constant 0 : i32
    %c0_i32_1 = arith.constant 0 : i32
    return %c0_i32, %c0_i32_0 : i32, i32
  }
  func.func @transform_4(%arg0: i32) -> (i32, i32) {
    %c0_i32 = arith.constant 0 : i32
    %c0_i32_0 = arith.constant 0 : i32
    %c0_i32_1 = arith.constant 0 : i32
    return %c0_i32, %c0_i32_0 : i32, i32
  }
  func.func @transform_5(%arg0: i32) -> (i32, i32) {
    %c0_i32 = arith.constant 0 : i32
    %c0_i32_0 = arith.constant 0 : i32
    return %arg0, %c0_i32 : i32, i32
  }
}

</mosaic_0001>

<bundles_post_ra>
// kernel: tpu_custom_call.1
= control target key start
LH: loop header
LB: loop body
LE: loop exit
PB: predicated region body
PF: predicated region fallthrough
CT: control target
= control target key end

     0   :  { %10 = vsyncpa [#allocation3], 0  ;;  %s473_s0 = inlined_call_operand.hbm [shape: f32[8,16], index: 0, kind: input, shape index: {}]   ;;  %s474_s1 = inlined_call_operand.hbm [shape: f32[16,128], index: 1, kind: input, shape index: {}]   ;;  %s475_s2 = inlined_call_operand.vmem [shape: f32[1,128], index: 2, kind: input, shape index: {}]   ;;  %s476_s3 = inlined_call_operand.hbm [shape: f32[128,128], index: 3, kind: input, shape index: {}]   ;;  %s477_s4 = inlined_call_operand.vmem [shape: f32[1,128], index: 4, kind: input, shape index: {}]   ;;  %s478_s5 = inlined_call_operand.hbm [shape: f32[8,128], index: 5, kind: output, shape index: {}]  }
   0x1   :  { %11 = vsyncpa [#allocation6], 0 }
   0x2   :  { %12 = vsyncpa [#allocation4], 0  ;;  %s417_s18 = smov [#allocation5]  }
   0x3   :  { %s28_s19 = sshll.u32 %s417_s18, 4  ;;  %s29_s19 = int_to_ptr.vmem [resolvable:$true] %s28_s19 }
   0x4   :  { %s339_s20 = scalar_lea.vmem %s29_s19, 256  ;;  %p344_p1 = scmp.lt.s32.totalorder %s29_s19, %s29_s19 }
   0x5   :  { %p340_p0 = scmp.ne.s32.totalorder %s29_s19, %s339_s20  ;;  %p345_p2 = scmp.lt.s32.totalorder %s339_s20, %s339_s20 }
   0x7   :  { %p346_p3 = por %p345_p2, %p344_p1 }
   0x9   :  { %p347_p4 = pnand %p346_p3, %p340_p0 }
   0xb   :  { %350 = shalt.err (!%p347_p4)
}
   0xc   :  { %s418_s21 = smov 128   ;;  %s419_s22 = smov 8  }
   0xd   :  { %34 = dma.hbm_to_vmem [thread:$0]  %s474_s1, 256, %s29_s19, [#allocation6], %s418_s21, %s418_s21, %s419_s22  }
   0xe   :  { %s420_s25 = smov [#allocation2]   ;;  %s421_s27 = smov [#allocation7]  }
   0xf   :  { %s19_s26 = sshll.u32 %s420_s25, 4  ;;  %s42_s28 = sshll.u32 %s421_s27, 4  ;;  %s20_s26 = int_to_ptr.vmem [resolvable:$true] %s19_s26  ;;  %s43_s28 = int_to_ptr.vmem [resolvable:$true] %s42_s28 }
  0x10   :  { %s359_s29 = scalar_lea.vmem %s20_s26, 128  ;;  %p364_p6 = scmp.lt.s32.totalorder %s20_s26, %s20_s26 }
  0x11   :  { %p360_p5 = scmp.ne.s32.totalorder %s20_s26, %s359_s29  ;;  %p365_p7 = scmp.lt.s32.totalorder %s359_s29, %s359_s29 }
  0x13   :  { %p366_p8 = por %p365_p7, %p364_p6 }
  0x15   :  { %p367_p9 = pnand %p366_p8, %p360_p5 }
  0x17   :  { %370 = shalt.err (!%p367_p9)
}
  0x18   :  { %22 = dma.hbm_to_vmem [thread:$0]  %s473_s0, 128, %s20_s26, [#allocation3]  }
  0x19   :  { %s379_s7 = scalar_lea.vmem %s43_s28, 2048  ;;  %p384_p11 = scmp.lt.s32.totalorder %s43_s28, %s43_s28 }
  0x1a   :  { %p380_p10 = scmp.ne.s32.totalorder %s43_s28, %s379_s7  ;;  %p385_p12 = scmp.lt.s32.totalorder %s379_s7, %s379_s7 }
  0x1c   :  { %p386_p13 = por %p385_p12, %p384_p11 }
  0x1e   :  { %p387_p0 = pnand %p386_p13, %p380_p10 }
  0x20   :  { %390 = shalt.err (!%p387_p0)
}
  0x21   :  { %48 = dma.hbm_to_vmem [thread:$0]  %s476_s3, 2048, %s43_s28, [#allocation6], %s418_s21, %s418_s21, %s419_s22  }
  0x22   :  { %411 = dma.done.wait [#allocation3], 128  }
  0x23   :  { %412 = vsyncadd [#allocation3], 4294967168 }
  0x24   :  { %413 = dma.done.wait [#allocation6], 2304  }
  0x25   :  { %414 = vsyncadd [#allocation6], 4294964992  ;;  %v422_v0 = vmov 0.0   ;;  %vm423_vm0 = vmmov 0   ;;  %v62_v1 = vld [vmem:[#allocation5 + $0x8] sm:$0xff]  ;;  %v61_v2 = vld [vmem:[#allocation5] sm:$0xff] }
  0x26   :  { %281 = vmatprep.subr.mxu0 %v422_v0  ;;  %285 = vmatprep.mubr.msk.f32.mxu0 %vm423_vm0, %v422_v0  ;;  %v60_v3 = vld [vmem:[#allocation2] sm:$0xff]  ;;  %vm70_vm1 = vcmask 130048   ;;  %v161_v4 = vld [vmem:[#allocation7 + $0x78] sm:$0xff]  ;;  %v160_v5 = vld [vmem:[#allocation7 + $0x70] sm:$0xff]  ;;  %s424_s11 = smov [#allocation8]  }
  0x27   :  { %288 = vmatprep.subr.mxu1 %v422_v0  ;;  %320 = vmatprep.mubr.msk.f32.mxu1 %vm423_vm0, %v422_v0  ;;  %v159_v6 = vld [vmem:[#allocation7 + $0x68] sm:$0xff]  ;;  %v158_v7 = vld [vmem:[#allocation7 + $0x60] sm:$0xff]  ;;  %v157_v8 = vld [vmem:[#allocation7 + $0x58] sm:$0xff]  ;;  %s248_s12 = sshll.u32 %s424_s11, 4  ;;  %s249_s12 = int_to_ptr.vmem [resolvable:$true] %s248_s12 }
  0x28   :  { %282 = vmatpush3.msra.mxu0 %v62_v1  ;;  %289 = vmatpush3.msra.mxu1 %v161_v4  ;;  %v156_v9 = vld [vmem:[#allocation7 + $0x50] sm:$0xff]  ;;  %v155_v10 = vld [vmem:[#allocation7 + $0x48] sm:$0xff]  ;;  %v154_v11 = vld [vmem:[#allocation7 + $0x40] sm:$0xff]  ;;  %p396_p2 = scmp.lt.s32.totalorder %s249_s12, %s249_s12 }
  0x29   :  { %283 = vmatprep.subr.mxu0 %v422_v0  ;;  %290 = vmatprep.subr.mxu1 %v422_v0  ;;  %v153_v12 = vld [vmem:[#allocation7 + $0x38] sm:$0xff]  ;;  %v152_v13 = vld [vmem:[#allocation7 + $0x30] sm:$0xff]  ;;  %v151_v14 = vld [vmem:[#allocation7 + $0x28] sm:$0xff] }
  0x2a   :  { %284 = vmatpush3.msra.mxu0 %v61_v2  ;;  %291 = vmatpush3.msra.mxu1 %v160_v5  ;;  %v150_v15 = vld [vmem:[#allocation7 + $0x20] sm:$0xff]  ;;  %v149_v16 = vld [vmem:[#allocation7 + $0x18] sm:$0xff]  ;;  %v148_v17 = vld [vmem:[#allocation7 + $0x10] sm:$0xff] }
  0x2b   :  { %286 = vmatmul.mubr.msk.f32.vlgmr.msra.gmra.mxu0 %vm70_vm1, %v60_v3  ;;  %292 = vmatprep.subr.mxu1 %v422_v0  ;;  %v147_v18 = vld [vmem:[#allocation7 + $0x8] sm:$0xff]  ;;  %v146_v19 = vld [vmem:[#allocation7] sm:$0xff] }
  0x2c   :  { %293 = vmatpush3.msra.mxu1 %v159_v6  ;;  %v258_v20 = vld [vmem:[%s475_s2] ss:$0 sm:$0xff]  ;;  %s391_s2 = scalar_lea.vmem %s249_s12, 128 }
  0x2d   :  { %294 = vmatprep.subr.mxu1 %v422_v0  ;;  %v260_v26 = vld [vmem:[%s477_s4] ss:$0 sm:$0xff]  ;;  %p392_p1 = scmp.ne.s32.totalorder %s249_s12, %s391_s2  ;;  %p397_p3 = scmp.lt.s32.totalorder %s391_s2, %s391_s2 }
  0x2e   :  { %295 = vmatpush3.msra.mxu1 %v158_v7 }
  0x2f   :  { %296 = vmatprep.subr.mxu1 %v422_v0  ;;  %p398_p4 = por %p397_p3, %p396_p2 }
  0x30   :  { %297 = vmatpush3.msra.mxu1 %v157_v8 }
  0x31   :  { %298 = vmatprep.subr.mxu1 %v422_v0  ;;  %p399_p5 = pnand %p398_p4, %p392_p1 }
  0x32   :  { %299 = vmatpush3.msra.mxu1 %v156_v9 }
  0x33   :  { %300 = vmatprep.subr.mxu1 %v422_v0 }
  0x34   :  { %301 = vmatpush3.msra.mxu1 %v155_v10 }
  0x35   :  { %302 = vmatprep.subr.mxu1 %v422_v0 }
  0x36   :  { %303 = vmatpush3.msra.mxu1 %v154_v11 }
  0x37   :  { %304 = vmatprep.subr.mxu1 %v422_v0 }
  0x38   :  { %305 = vmatpush3.msra.mxu1 %v153_v12 }
  0x39   :  { %306 = vmatprep.subr.mxu1 %v422_v0 }
  0x3a   :  { %307 = vmatpush3.msra.mxu1 %v152_v13 }
  0x3b   :  { %308 = vmatprep.subr.mxu1 %v422_v0 }
  0x3c   :  { %309 = vmatpush3.msra.mxu1 %v151_v14 }
  0x3d   :  { %310 = vmatprep.subr.mxu1 %v422_v0 }
  0x3e   :  { %311 = vmatpush3.msra.mxu1 %v150_v15 }
  0x3f   :  { %312 = vmatprep.subr.mxu1 %v422_v0 }
  0x40   :  { %313 = vmatpush3.msra.mxu1 %v149_v16 }
  0x41   :  { %314 = vmatprep.subr.mxu1 %v422_v0 }
  0x42   :  { %315 = vmatpush3.msra.mxu1 %v148_v17 }
  0x43   :  { %316 = vmatprep.subr.mxu1 %v422_v0 }
  0x44   :  { %317 = vmatpush3.msra.mxu1 %v147_v18 }
  0x45   :  { %318 = vmatprep.subr.mxu1 %v422_v0 }
  0x46   :  { %319 = vmatpush3.msra.mxu1 %v146_v19 }
  0xeb   :  { %v140_v21 = vpop.f32.mrf.mxu0 }
  0xec   :  { %v141_v22 = vadd.f32 %v258_v20, %v140_v21 }
  0xed   :  { %v287_v23 = vpop.f32.mrf.mxu0 }
  0xee   :  { %v144_v24 = vmul.f32 0.01, %v141_v22 }
  0xf0   :  { %v145_v25 = vmax.f32 %v141_v22, %v144_v24 }
  0xf2   :  { %321 = vmatmul.mubr.f32.vlgmr.msra.gmra.mxu1 %v145_v25 }
 0x1b2   :  { %v235_v27 = vpop.f32.mrf.mxu1 }
 0x1b3   :  { %v236_v28 = vadd.f32 %v260_v26, %v235_v27 }
 0x1b4   :  { %v322_v29 = vpop.f32.mrf.mxu1 }
 0x1b5   :  { %v239_v30 = vmul.f32 0.01, %v236_v28 }
 0x1b7   :  { %v240_v31 = vmax.f32 %v236_v28, %v239_v30 }
 0x1b9   :  { %241 = vst [vmem:[#allocation8] sm:$0xff] %v240_v31 }
 0x1ba   :  { %402 = shalt.err (!%p399_p5)
}
 0x1bb   :  { %251 = dma.vmem_to_hbm [thread:$0]  %s249_s12, 128, %s478_s5, [#allocation4]  }
 0x1bc   :  { %415 = dma.done.wait [#allocation4], 128  }
 0x1bd   :  { %416 = vsyncadd [#allocation4], 4294967168 }
 0x1be   :  { %255 = vsyncpa [#allocation3], 1 }
 0x1bf   :  { %256 = vsyncpa [#allocation6], 1 }
 0x1c0   :  { %257 = vsyncpa [#allocation4], 1 }

</bundles_post_ra>
